<compile_context>
chip_gen: v6e
topology: v6e:2x2x1
jax: 0.10.0
libtpu: 0.0.40
codegen_flags: <defaults>
</compile_context>

<pallas_src>
import jax
import jax.numpy as jnp
from jax.experimental import pallas as pl
from jax.experimental.pallas import tpu as pltpu


def sa_kernel(x_ref, w_ref, b_ref, o_ref):
    # x_ref: (B, C, in_dim)   f32, full input (same block every grid step)
    # w_ref: (in_dim, col_blk) bf16 folded-weight column block
    # b_ref: (1, col_blk)     f32 folded-bias column block
    # o_ref: (B, col_blk)     output column block (lane-dense, mult. of 128)
    mask = jnp.max(x_ref[...], axis=1)                    # (B, in_dim)  VPU reduce
    out = jnp.dot(mask.astype(w_ref.dtype), w_ref[...],
                  preferred_element_type=jnp.float32)     # single MXU matmul, f32 acc
    o_ref[...] = (out + b_ref[...]).astype(o_ref.dtype)   # f32 bias in the epilogue


def prepare_params(w1, b1, w2, b2, *, weight_dtype=jnp.bfloat16):
    """One-time fold of the two per-head Linears into a single matmul.

        out[b,i,d] = sum_k mask[b,k] * w_fold[k,i,d] + b_fold[i,d]
        w_fold[k,i,d] = sum_j w1[k,j,d] * w2[j,i,d]
        b_fold[i,d]   = sum_j b1[0,j,d] * w2[j,i,d] + b2[0,i,d]

    Column order is col = i*num + d, so the kernel output reshaped to
    (B, in_dim, num) is already the PyTorch layout (no transpose anywhere).
    Fold is done in f32; only the large weight is down-cast (bf16 by default,
    full MXU rate on v5e/v6e/v7x). Call once at init, NOT per forward call.
    """
    in_dim, hid, num = w1.shape
    hp = jax.lax.Precision.HIGHEST
    w_fold = jnp.einsum('kjd,jid->kid', w1, w2, precision=hp)            # (in_dim, in_dim, num)
    b_fold = jnp.einsum('jd,jid->id', b1[0], w2, precision=hp) + b2[0]   # (in_dim, num)
    w_all = w_fold.reshape(in_dim, in_dim * num).astype(weight_dtype)
    b_all = b_fold.reshape(1, in_dim * num)                              # keep f32
    return w_all, b_all


def _tensorcores_per_chip():
    """2 on v7x, 1 on v5e/v6e (best-effort detection; default 1)."""
    try:
        kind = jax.devices()[0].device_kind.lower()
    except Exception:
        return 1
    return 2 if ("v7" in kind or "7x" in kind) else 1


@jax.jit
def sa_forward(x, w_all, b_all):
    """Pallas SA forward.  x: (B, C, in_dim) -> (B, in_dim, num)."""
    B, C, in_dim = x.shape
    n_cols = w_all.shape[1]
    num = n_cols // in_dim

    # Grid shaping: 1 step on single-TC chips (v5e/v6e) — any split there is
    # pure per-step overhead plus a redundant max(x).  On v7x split the folded
    # columns in two and mark the axis CORE_PARALLEL so each TensorCore takes
    # one 128-lane-aligned half of the weight DMA.
    if _tensorcores_per_chip() == 2 and n_cols % 256 == 0:
        n_blocks = 2
        dim_sem = (pltpu.CORE_PARALLEL,)
    else:
        n_blocks = 1
        dim_sem = ("arbitrary",)
    col_blk = n_cols // n_blocks
    assert col_blk % 128 == 0, f"col_blk={col_blk} must be lane-aligned (x128)"

    cost = pl.CostEstimate(
        flops=2 * B * in_dim * n_cols,
        bytes_accessed=(jnp.dtype(w_all.dtype).itemsize * in_dim * n_cols
                        + jnp.dtype(x.dtype).itemsize * B * C * in_dim
                        + jnp.dtype(b_all.dtype).itemsize * n_cols
                        + jnp.dtype(x.dtype).itemsize * B * n_cols),
        transcendentals=0,
    )

    out_flat = pl.pallas_call(
        sa_kernel,
        out_shape=jax.ShapeDtypeStruct((B, n_cols), x.dtype),
        grid=(n_blocks,),
        in_specs=[
            pl.BlockSpec((B, C, in_dim), lambda i: (0, 0, 0)),   # constant block
            pl.BlockSpec((in_dim, col_blk), lambda i: (0, i)),
            pl.BlockSpec((1, col_blk), lambda i: (0, i)),
        ],
        out_specs=pl.BlockSpec((B, col_blk), lambda i: (0, i)),
        compiler_params=pltpu.CompilerParams(dimension_semantics=dim_sem),
        cost_estimate=cost,
    )(x, w_all, b_all)

    # Column order was chosen at fold time, so this reshape (no transpose, no
    # extra kernel launch) is already the PyTorch output layout (B, in_dim, num).
    return out_flat.reshape(B, in_dim, num)


def init_weights(key, din, dout, dnum):
    # nn.init.normal_(std=0.005) + constant bias 0.1, deterministic via PRNGKey.
    w = jax.random.normal(key, (din, dout, dnum), dtype=jnp.float32) * 0.005
    b = jnp.full((1, dout, dnum), 0.1, dtype=jnp.float32)
    return w, b


def sa_reference(x, w1, b1, w2, b2):
    """Faithful (two-einsum, f32) JAX port of the PyTorch SA.forward."""
    hp = jax.lax.Precision.HIGHEST
    mask = jnp.max(x, axis=1)                                      # (B, in_dim)
    h = jnp.einsum('bi,ijd->bjd', mask, w1, precision=hp) + b1     # (B, hid, num)
    return jnp.einsum('bjd,jid->bid', h, w2, precision=hp) + b2    # (B, in_dim, num)


if __name__ == "__main__":
    # in_dim = H*W = 16*16 = 256 flattened spatial, C = 4 feature channels,
    # batch = 2, num = 8 heads, hid = in_dim // 2 = 128 (matches the module).
    B, C, in_dim, num = 2, 4, 256, 8
    hid = in_dim // 2

    key = jax.random.PRNGKey(0)
    kx, k1, k2 = jax.random.split(key, 3)

    x = jax.random.normal(kx, (B, C, in_dim), dtype=jnp.float32)
    w1, b1 = init_weights(k1, in_dim, hid, num)
    w2, b2 = init_weights(k2, hid, in_dim, num)

    # One-time parameter preparation (hoisted out of the per-call forward path).
    w_all, b_all = jax.block_until_ready(prepare_params(w1, b1, w2, b2))

    out = sa_forward(x, w_all, b_all)
    out = jax.block_until_ready(out)

    ref = sa_reference(x, w1, b1, w2, b2)
    assert out.shape == (B, in_dim, num)
    err = float(jnp.max(jnp.abs(out - ref)))
    # Folded weight is stored in bf16 (accumulation in f32, bias add in f32),
    # so tolerance is bf16-level rather than the pure-f32 2e-5.
    assert jnp.allclose(out, ref, atol=1e-2, rtol=1e-2), f"max abs err = {err}"

    print("KERNEL_OK")
</pallas_src>

<mosaic_0001>
module attributes {stable_mosaic.version = 11 : i64} {
  func.func @sa_kernel(%arg0: i32, %arg1: memref<2x4x256xf32, #tpu.memory_space<vmem>>, %arg2: memref<256x2048xbf16, #tpu.memory_space<vmem>>, %arg3: memref<1x2048xf32, #tpu.memory_space<vmem>>, %arg4: memref<2x2048xf32, #tpu.memory_space<vmem>>) attributes {dimension_semantics = [#tpu.dimension_semantics<arbitrary>], iteration_bounds = array<i64: 1>, scalar_prefetch = 0 : i64, scratch_operands = 0 : i64, tpu.core_type = #tpu.core_type<tc>, window_params = [{pipeline_mode = #tpu.pipeline_mode<synchronous>, transform_indices = @transform_0, window_bounds = array<i64: 2, 4, 256>}, {transform_indices = @transform_1, window_bounds = array<i64: 256, 2048>}, {transform_indices = @transform_2, window_bounds = array<i64: 1, 2048>}, {transform_indices = @transform_3, window_bounds = array<i64: 2, 2048>}]} {
    %c0 = arith.constant 0 : index
    %c0_0 = arith.constant 0 : index
    %c0_1 = arith.constant 0 : index
    %0 = vector.load %arg1[%c0, %c0_0, %c0_1] : memref<2x4x256xf32, #tpu.memory_space<vmem>>, vector<2x4x256xf32>
    %cst = arith.constant dense<0xFF800000> : vector<2x256xf32>
    %1 = vector.multi_reduction <maximumf>, %0, %cst [1] : vector<2x4x256xf32> to vector<2x256xf32>
    %2 = arith.truncf %1 : vector<2x256xf32> to vector<2x256xbf16>
    %c0_2 = arith.constant 0 : index
    %c0_3 = arith.constant 0 : index
    %3 = vector.load %arg2[%c0_2, %c0_3] : memref<256x2048xbf16, #tpu.memory_space<vmem>>, vector<256x2048xbf16>
    %cst_4 = arith.constant dense<0.000000e+00> : vector<2x2048xf32>
    %4 = tpu.matmul %2, %3, %cst_4 {dimension_numbers = #tpu.dot_dimension_numbers<[1], [0], [0], [1], [0, 0, 1, 1], [], []>} : vector<2x256xbf16>, vector<256x2048xbf16>, vector<2x2048xf32> -> vector<2x2048xf32>
    %c0_5 = arith.constant 0 : index
    %c0_6 = arith.constant 0 : index
    %5 = vector.load %arg3[%c0_5, %c0_6] : memref<1x2048xf32, #tpu.memory_space<vmem>>, vector<1x2048xf32>
    %6 = vector.broadcast %5 : vector<1x2048xf32> to vector<2x2048xf32>
    %7 = arith.addf %4, %6 : vector<2x2048xf32>
    %c0_7 = arith.constant 0 : index
    %c0_8 = arith.constant 0 : index
    %8 = vector.load %arg4[%c0_7, %c0_8] : memref<2x2048xf32, #tpu.memory_space<vmem>>, vector<2x2048xf32>
    tpu.vector_store %arg4[%c0_7, %c0_8], %7 {strides = array<i32>} : memref<2x2048xf32, #tpu.memory_space<vmem>>, vector<2x2048xf32>,
    return
  }
  func.func @transform_0(%arg0: i32) -> (i32, i32, i32) {
    %c0_i32 = arith.constant 0 : i32
    %c0_i32_0 = arith.constant 0 : i32
    %c0_i32_1 = arith.constant 0 : i32
    %c0_i32_2 = arith.constant 0 : i32
    return %c0_i32, %c0_i32_0, %c0_i32_1 : i32, i32, i32
  }
  func.func @transform_1(%arg0: i32) -> (i32, i32) {
    %c0_i32 = arith.constant 0 : i32
    %c0_i32_0 = arith.constant 0 : i32
    return %c0_i32, %arg0 : i32, i32
  }
  func.func @transform_2(%arg0: i32) -> (i32, i32) {
    %c0_i32 = arith.constant 0 : i32
    %c0_i32_0 = arith.constant 0 : i32
    return %c0_i32, %arg0 : i32, i32
  }
  func.func @transform_3(%arg0: i32) -> (i32, i32) {
    %c0_i32 = arith.constant 0 : i32
    %c0_i32_0 = arith.constant 0 : i32
    return %c0_i32, %arg0 : i32, i32
  }
}

</mosaic_0001>

<bundles_post_ra>
// kernel: sa_forward.1
= control target key start
LH: loop header
LB: loop body
LE: loop exit
PB: predicated region body
PF: predicated region fallthrough
CT: control target
= control target key end

     0   :  { %8 = vsyncpa [#allocation3], 0  ;;  %s2585_s0 = inlined_call_operand.hbm [shape: f32[2,4,256], index: 0, kind: input, shape index: {}]   ;;  %s2586_s1 = inlined_call_operand.hbm [shape: bf16[256,2048], index: 1, kind: input, shape index: {}]   ;;  %s2587_s2 = inlined_call_operand.hbm [shape: f32[1,2048], index: 2, kind: input, shape index: {}]   ;;  %s2588_s3 = inlined_call_operand.vmem [shape: f32[2,2048], index: 3, kind: output, shape index: {}]  }
   0x1   :  { %9 = vsyncpa [#allocation5], 0  ;;  %s2485_s12 = smov [#allocation4]  }
   0x2   :  { %s27_s13 = sshll.u32 %s2485_s12, 4  ;;  %s28_s13 = int_to_ptr.vmem [resolvable:$true] %s27_s13 }
   0x3   :  { %s2429_s14 = scalar_lea.vmem %s28_s13, 32768  ;;  %p2434_p1 = scmp.lt.s32.totalorder %s28_s13, %s28_s13 }
   0x4   :  { %p2430_p0 = scmp.ne.s32.totalorder %s28_s13, %s2429_s14  ;;  %p2435_p2 = scmp.lt.s32.totalorder %s2429_s14, %s2429_s14 }
   0x6   :  { %p2436_p3 = por %p2435_p2, %p2434_p1 }
   0x8   :  { %p2437_p4 = pnand %p2436_p3, %p2430_p0 }
   0xa   :  { %2440 = shalt.err (!%p2437_p4)
}
   0xb   :  { %s2486_s15 = smov 1024   ;;  %s2487_s16 = smov 64  }
   0xc   :  { %33 = dma.hbm_to_vmem [thread:$0]  %s2586_s1, 32768, %s28_s13, [#allocation5], %s2486_s15, %s2486_s15, %s2487_s16  }
   0xd   :  { %s2488_s19 = smov [#allocation2]  }
   0xe   :  { %s15_s20 = sshll.u32 %s2488_s19, 4  ;;  %s16_s20 = int_to_ptr.vmem [resolvable:$true] %s15_s20 }
   0xf   :  { %s2449_s21 = scalar_lea.vmem %s16_s20, 256  ;;  %p2454_p6 = scmp.lt.s32.totalorder %s16_s20, %s16_s20 }
  0x10   :  { %p2450_p5 = scmp.ne.s32.totalorder %s16_s20, %s2449_s21  ;;  %p2455_p7 = scmp.lt.s32.totalorder %s2449_s21, %s2449_s21 }
  0x12   :  { %p2456_p8 = por %p2455_p7, %p2454_p6 }
  0x14   :  { %p2457_p9 = pnand %p2456_p8, %p2450_p5 }
  0x16   :  { %2460 = shalt.err (!%p2457_p9)
}
  0x17   :  { %s2489_s22 = smov 128   ;;  %s2490_s23 = smov 8  }
  0x18   :  { %21 = dma.hbm_to_vmem [thread:$0]  %s2585_s0, 256, %s16_s20, [#allocation3], %s2489_s22, %s2489_s22, %s2490_s23  }
  0x19   :  { %s2491_s26 = smov [#allocation6]  }
  0x1a   :  { %s40_s27 = sshll.u32 %s2491_s26, 4  ;;  %s41_s27 = int_to_ptr.vmem [resolvable:$true] %s40_s27 }
  0x1b   :  { %s2469_s1 = scalar_lea.vmem %s41_s27, 256  ;;  %p2474_p11 = scmp.lt.s32.totalorder %s41_s27, %s41_s27 }
  0x1c   :  { %p2470_p10 = scmp.ne.s32.totalorder %s41_s27, %s2469_s1  ;;  %p2475_p12 = scmp.lt.s32.totalorder %s2469_s1, %s2469_s1 }
  0x1e   :  { %p2476_p13 = por %p2475_p12, %p2474_p11 }
  0x20   :  { %p2477_p0 = pnand %p2476_p13, %p2470_p10 }
  0x22   :  { %2480 = shalt.err (!%p2477_p0)
}
  0x23   :  { %43 = dma.hbm_to_vmem [thread:$0]  %s2587_s2, 256, %s41_s27, [#allocation5]  }
  0x24   :  { %2481 = dma.done.wait [#allocation3], 256  }
  0x25   :  { %2482 = vsyncadd [#allocation3], 4294967040 }
  0x26   :  { %2483 = dma.done.wait [#allocation5], 33024  }
  0x27   :  { %2484 = vsyncadd [#allocation5], 4294934272  ;;  %v206_v0 = vld [vmem:[#allocation4 + $0x380] sm:$0xff]  ;;  %v207_v2 = vld [vmem:[#allocation4 + $0x388] sm:$0xff]  ;;  %vm61_vm0 = vcmask 1043456   ;;  %vm442_vm1 = vcmask 1041409  }
  0x28   :  { %v214_v1 = vld [vmem:[#allocation4 + $0x3c0] sm:$0xff]  ;;  %v215_v4 = vld [vmem:[#allocation4 + $0x3c8] sm:$0xff]  ;;  %v53_v55 = vld [vmem:[#allocation2] sm:$0xff] }
  0x29   :  { %v2268_v3 = vcombine.high %v206_v0, %v214_v1  ;;  %v2267_v5 = vcombine.low %v206_v0, %v214_v1  ;;  %v190_v6 = vld [vmem:[#allocation4 + $0x300] sm:$0xff]  ;;  %v2270_v8 = vcombine.high %v207_v2, %v215_v4  ;;  %v2269_v9 = vcombine.low %v207_v2, %v215_v4  ;;  %v191_v11 = vld [vmem:[#allocation4 + $0x308] sm:$0xff]  ;;  %v54_v56 = vld [vmem:[#allocation2 + $0x8] sm:$0xff] }
  0x2a   :  { %v198_v7 = vld [vmem:[#allocation4 + $0x340] sm:$0xff]  ;;  %v199_v12 = vld [vmem:[#allocation4 + $0x348] sm:$0xff]  ;;  %v57_v58 = vcombine.high %v53_v55, %v53_v55  ;;  %v58_v59 = vcombine.high %v54_v56, %v54_v56 }
  0x2b   :  { %v2252_v10 = vcombine.high %v190_v6, %v198_v7  ;;  %v174_v13 = vld [vmem:[#allocation4 + $0x280] sm:$0xff]  ;;  %1729 = vmatprep.subr.bf16.mxu0 %v2268_v3  ;;  %v2254_v14 = vcombine.high %v191_v11, %v199_v12  ;;  %v175_v16 = vld [vmem:[#allocation4 + $0x288] sm:$0xff]  ;;  %1770 = vmatprep.subr.bf16.mxu1 %v2270_v8  ;;  %v2251_v18 = vcombine.low %v190_v6, %v198_v7  ;;  %v76_v6 = vsel %vm61_vm0, %v54_v56, -inf }
  0x2c   :  { %v182_v15 = vld [vmem:[#allocation4 + $0x2c0] sm:$0xff]  ;;  %v183_v17 = vld [vmem:[#allocation4 + $0x2c8] sm:$0xff]  ;;  %1730 = vmatpush1.bf16.msra.mxu0 %v2267_v5  ;;  %1771 = vmatpush1.bf16.msra.mxu1 %v2269_v9  ;;  %v2253_v19 = vcombine.low %v191_v11, %v199_v12  ;;  %v69_v1 = vsel %vm61_vm0, %v57_v58, -inf  ;;  %v83_v2 = vsel %vm61_vm0, %v58_v59, -inf  ;;  %v62_v5 = vsel %vm61_vm0, %v53_v55, -inf }
  0x2d   :  { %1731 = vmatprep.subr.bf16.mxu0 %v2252_v10  ;;  %v2236_v20 = vcombine.high %v174_v13, %v182_v15  ;;  %1772 = vmatprep.subr.bf16.mxu1 %v2254_v14  ;;  %v2238_v21 = vcombine.high %v175_v16, %v183_v17  ;;  %v158_v22 = vld [vmem:[#allocation4 + $0x200] sm:$0xff]  ;;  %v159_v24 = vld [vmem:[#allocation4 + $0x208] sm:$0xff]  ;;  %v2235_v26 = vcombine.low %v174_v13, %v182_v15  ;;  %v70_v3 = vrot.slane %v69_v1, 4 }
  0x2e   :  { %v166_v23 = vld [vmem:[#allocation4 + $0x240] sm:$0xff]  ;;  %v167_v25 = vld [vmem:[#allocation4 + $0x248] sm:$0xff]  ;;  %v2237_v27 = vcombine.low %v175_v16, %v183_v17  ;;  %v84_v4 = vrot.slane %v83_v2, 4  ;;  %v63_v15 = vrot.slane %v62_v5, 4  ;;  %v77_v16 = vrot.slane %v76_v6, 4 }
  0x2f   :  { %v2220_v28 = vcombine.high %v158_v22, %v166_v23  ;;  %v2222_v29 = vcombine.high %v159_v24, %v167_v25  ;;  %v142_v30 = vld [vmem:[#allocation4 + $0x180] sm:$0xff]  ;;  %v143_v32 = vld [vmem:[#allocation4 + $0x188] sm:$0xff]  ;;  %v2219_v34 = vcombine.low %v158_v22, %v166_v23  ;;  %v2221_v35 = vcombine.low %v159_v24, %v167_v25 }
  0x30   :  { %1732 = vmatpush1.bf16.msra.mxu0 %v2251_v18  ;;  %1773 = vmatpush1.bf16.msra.mxu1 %v2253_v19  ;;  %v150_v31 = vld [vmem:[#allocation4 + $0x1c0] sm:$0xff]  ;;  %v151_v33 = vld [vmem:[#allocation4 + $0x1c8] sm:$0xff]  ;;  %v71_v12 = vmax.f32 %v69_v1, %v70_v3  ;;  %v85_v13 = vmax.f32 %v83_v2, %v84_v4 }
  0x31   :  { %1733 = vmatprep.subr.bf16.mxu0 %v2236_v20  ;;  %1774 = vmatprep.subr.bf16.mxu1 %v2238_v21  ;;  %v2204_v36 = vcombine.high %v142_v30, %v150_v31  ;;  %v2206_v37 = vcombine.high %v143_v32, %v151_v33  ;;  %v126_v38 = vld [vmem:[#allocation4 + $0x100] sm:$0xff]  ;;  %v127_v40 = vld [vmem:[#allocation4 + $0x108] sm:$0xff]  ;;  %v2203_v42 = vcombine.low %v142_v30, %v150_v31 }
  0x32   :  { %v134_v39 = vld [vmem:[#allocation4 + $0x140] sm:$0xff]  ;;  %v135_v41 = vld [vmem:[#allocation4 + $0x148] sm:$0xff]  ;;  %v2205_v43 = vcombine.low %v143_v32, %v151_v33  ;;  %v72_v19 = vrot.slane %v71_v12, 2  ;;  %v86_v20 = vrot.slane %v85_v13, 2  ;;  %v78_v30 = vmax.f32 %v76_v6, %v77_v16 }
  0x33   :  { %v2188_v44 = vcombine.high %v126_v38, %v134_v39  ;;  %v2190_v45 = vcombine.high %v127_v40, %v135_v41  ;;  %v110_v46 = vld [vmem:[#allocation4 + $0x80] sm:$0xff]  ;;  %v111_v48 = vld [vmem:[#allocation4 + $0x88] sm:$0xff]  ;;  %v2187_v50 = vcombine.low %v126_v38, %v134_v39  ;;  %v2189_v52 = vcombine.low %v127_v40, %v135_v41 }
  0x34   :  { %1734 = vmatpush1.bf16.msra.mxu0 %v2235_v26  ;;  %1775 = vmatpush1.bf16.msra.mxu1 %v2237_v27  ;;  %v118_v47 = vld [vmem:[#allocation4 + $0xc0] sm:$0xff]  ;;  %v119_v49 = vld [vmem:[#allocation4 + $0xc8] sm:$0xff]  ;;  %v73_v26 = vmax.f32 %v71_v12, %v72_v19  ;;  %v87_v27 = vmax.f32 %v85_v13, %v86_v20 }
  0x35   :  { %1735 = vmatprep.subr.bf16.mxu0 %v2220_v28  ;;  %1776 = vmatprep.subr.bf16.mxu1 %v2222_v29  ;;  %v94_v51 = vld [vmem:[#allocation4] sm:$0xff]  ;;  %v2172_v53 = vcombine.high %v110_v46, %v118_v47  ;;  %v2174_v57 = vcombine.high %v111_v48, %v119_v49  ;;  %v2171_v60 = vcombine.low %v110_v46, %v118_v47  ;;  %v95_v61 = vld [vmem:[#allocation4 + $0x8] sm:$0xff] }
  0x36   :  { %v102_v54 = vld [vmem:[#allocation4 + $0x40] sm:$0xff]  ;;  %v103_v62 = vld [vmem:[#allocation4 + $0x48] sm:$0xff]  ;;  %v2173_v63 = vcombine.low %v111_v48, %v119_v49  ;;  %v64_v29 = vmax.f32 %v62_v5, %v63_v15  ;;  %v74_v33 = vrot.slane %v73_v26, 1 }
  0x37   :  { %v2156_v0 = vcombine.high %v94_v51, %v102_v54  ;;  %v2158_v7 = vcombine.high %v95_v61, %v103_v62  ;;  %v334_v8 = vld [vmem:[#allocation4 + $0x780] sm:$0xff]  ;;  %v335_v10 = vld [vmem:[#allocation4 + $0x788] sm:$0xff]  ;;  %v2155_v14 = vcombine.low %v94_v51, %v102_v54  ;;  %v2157_v17 = vcombine.low %v95_v61, %v103_v62 }
  0x38   :  { %1736 = vmatpush1.bf16.msra.mxu0 %v2219_v34  ;;  %1777 = vmatpush1.bf16.msra.mxu1 %v2221_v35  ;;  %v342_v9 = vld [vmem:[#allocation4 + $0x7c0] sm:$0xff]  ;;  %v343_v11 = vld [vmem:[#allocation4 + $0x7c8] sm:$0xff]  ;;  %v88_v34 = vrot.slane %v87_v27, 1  ;;  %v75_v40 = vmax.f32 %v73_v26, %v74_v33 }
  0x39   :  { %1737 = vmatprep.subr.bf16.mxu0 %v2204_v36  ;;  %1778 = vmatprep.subr.bf16.mxu1 %v2206_v37  ;;  %v2396_v18 = vcombine.high %v334_v8, %v342_v9  ;;  %v2398_v21 = vcombine.high %v335_v10, %v343_v11  ;;  %v318_v22 = vld [vmem:[#allocation4 + $0x700] sm:$0xff]  ;;  %v319_v24 = vld [vmem:[#allocation4 + $0x708] sm:$0xff]  ;;  %v2395_v28 = vcombine.low %v334_v8, %v342_v9 }
  0x3a   :  { %v326_v23 = vld [vmem:[#allocation4 + $0x740] sm:$0xff]  ;;  %v327_v25 = vld [vmem:[#allocation4 + $0x748] sm:$0xff]  ;;  %v2397_v31 = vcombine.low %v335_v10, %v343_v11  ;;  %v89_v41 = vmax.f32 %v87_v27, %v88_v34  ;;  %v91_v47 = vpack.c.bf16 %v75_v40, %v75_v40  ;;  %v208_v40 = vld [vmem:[#allocation4 + $0x390] sm:$0xff] }
  0x3b   :  { %v2380_v32 = vcombine.high %v318_v22, %v326_v23  ;;  %v2382_v35 = vcombine.high %v319_v24, %v327_v25  ;;  %v302_v36 = vld [vmem:[#allocation4 + $0x680] sm:$0xff]  ;;  %v303_v38 = vld [vmem:[#allocation4 + $0x688] sm:$0xff] }
  0x3c   :  { %1738 = vmatpush1.bf16.msra.mxu0 %v2203_v42  ;;  %1779 = vmatpush1.bf16.msra.mxu1 %v2205_v43  ;;  %v310_v37 = vld [vmem:[#allocation4 + $0x6c0] sm:$0xff]  ;;  %v311_v39 = vld [vmem:[#allocation4 + $0x6c8] sm:$0xff]  ;;  %v2379_v42 = vcombine.low %v318_v22, %v326_v23  ;;  %v2381_v43 = vcombine.low %v319_v24, %v327_v25  ;;  %v93_v48 = vpack.c.bf16 %v89_v41, %v89_v41  ;;  %v439_v54 = vunpack.c.l.b16 %v91_v47  ;;  %v216_v41 = vld [vmem:[#allocation4 + $0x3d0] sm:$0xff] }
  0x3d   :  { %1739 = vmatprep.subr.bf16.mxu0 %v2188_v44  ;;  %1780 = vmatprep.subr.bf16.mxu1 %v2190_v45  ;;  %v65_v44 = vrot.slane %v64_v29, 2  ;;  %v79_v45 = vrot.slane %v78_v30, 2  ;;  %v2364_v46 = vcombine.high %v302_v36, %v310_v37  ;;  %v2366_v49 = vcombine.high %v303_v38, %v311_v39  ;;  %v294_v51 = vld [vmem:[#allocation4 + $0x640] sm:$0xff]  ;;  %v271_v2 = vld [vmem:[#allocation4 + $0x588] sm:$0xff] }
  0x3e   :  { %v441_v55 = vunpack.c.l.b16 %v93_v48  ;;  %v2363_v56 = vcombine.low %v302_v36, %v310_v37  ;;  %v2365_v59 = vcombine.low %v303_v38, %v311_v39  ;;  %v279_v3 = vld [vmem:[#allocation4 + $0x5c8] sm:$0xff]  ;;  %v254_v10 = vld [vmem:[#allocation4 + $0x500] sm:$0xff]  ;;  %v2272_v47 = vcombine.high %v208_v40, %v216_v41 }
  0x3f   :  { %v80_v58 = vmax.f32 %v78_v30, %v79_v45  ;;  %v2334_v9 = vcombine.high %v271_v2, %v279_v3  ;;  %v262_v11 = vld [vmem:[#allocation4 + $0x540] sm:$0xff]  ;;  %v255_v12 = vld [vmem:[#allocation4 + $0x508] sm:$0xff] }
  0x40   :  { %1740 = vmatpush1.bf16.msra.mxu0 %v2187_v50  ;;  %1781 = vmatpush1.bf16.msra.mxu1 %v2189_v52  ;;  %v286_v50 = vld [vmem:[#allocation4 + $0x600] sm:$0xff]  ;;  %v287_v52 = vld [vmem:[#allocation4 + $0x608] sm:$0xff]  ;;  %v444_v61 = vsel %vm442_vm1, %v441_v55, %v439_v54  ;;  %v2315_v24 = vcombine.low %v254_v10, %v262_v11  ;;  %v2271_v54 = vcombine.low %v208_v40, %v216_v41 }
  0x41   :  { %1741 = vmatprep.subr.bf16.mxu0 %v2172_v53  ;;  %1782 = vmatprep.subr.bf16.mxu1 %v2174_v57  ;;  %v295_v53 = vld [vmem:[#allocation4 + $0x648] sm:$0xff]  ;;  %v66_v57 = vmax.f32 %v64_v29, %v65_v44  ;;  %v2527_v1 = vpack.c.b16 %v444_v61, %v444_v61  ;;  %v2347_v4 = vcombine.low %v286_v50, %v294_v51  ;;  %v81_v6 = vrot.slane %v80_v58, 1  ;;  %v238_v20 = vld [vmem:[#allocation4 + $0x480] sm:$0xff]  ;;  %v185_v61 = vld [vmem:[#allocation4 + $0x2d8] sm:$0xff] }
  0x42   :  { %v2350_v62 = vcombine.high %v287_v52, %v295_v53  ;;  %v263_v13 = vld [vmem:[#allocation4 + $0x548] sm:$0xff]  ;;  %v222_v30 = vld [vmem:[#allocation4 + $0x400] sm:$0xff] }
  0x43   :  { %1761 = vmatprep.mubr.bf16.mxu0 %v2527_v1  ;;  %v67_v5 = vrot.slane %v66_v57, 1  ;;  %1802 = vmatprep.mubr.bf16.mxu1 %v2527_v1  ;;  %v82_v16 = vmax.f32 %v80_v58, %v81_v6  ;;  %v2318_v19 = vcombine.high %v255_v12, %v263_v13  ;;  %v239_v22 = vld [vmem:[#allocation4 + $0x488] sm:$0xff]  ;;  %v2317_v27 = vcombine.low %v255_v12, %v263_v13  ;;  %v176_v58 = vld [vmem:[#allocation4 + $0x290] sm:$0xff]  ;;  %v169_v6 = vld [vmem:[#allocation4 + $0x258] sm:$0xff] }
  0x44   :  { %1742 = vmatpush1.bf16.msra.mxu0 %v2171_v60  ;;  %1783 = vmatpush1.bf16.msra.mxu1 %v2173_v63  ;;  %v2348_v60 = vcombine.high %v286_v50, %v294_v51  ;;  %v270_v63 = vld [vmem:[#allocation4 + $0x580] sm:$0xff]  ;;  %v247_v23 = vld [vmem:[#allocation4 + $0x4c8] sm:$0xff]  ;;  %v200_v50 = vld [vmem:[#allocation4 + $0x350] sm:$0xff] }
  0x45   :  { %1743 = vmatprep.subr.bf16.mxu0 %v2156_v0  ;;  %1784 = vmatprep.subr.bf16.mxu1 %v2158_v7  ;;  %v278_v0 = vld [vmem:[#allocation4 + $0x5c0] sm:$0xff]  ;;  %v2349_v7 = vcombine.low %v287_v52, %v295_v53  ;;  %v68_v15 = vmax.f32 %v66_v57, %v67_v5  ;;  %v92_v26 = vpack.c.bf16 %v82_v16, %v82_v16  ;;  %v231_v33 = vld [vmem:[#allocation4 + $0x448] sm:$0xff]  ;;  %v193_v52 = vld [vmem:[#allocation4 + $0x318] sm:$0xff] }
  0x46   :  { %v2332_v8 = vcombine.high %v270_v63, %v278_v0  ;;  %v2302_v29 = vcombine.high %v239_v22, %v247_v23  ;;  %v2301_v37 = vcombine.low %v239_v22, %v247_v23  ;;  %v201_v53 = vld [vmem:[#allocation4 + $0x358] sm:$0xff]  ;;  %v152_v12 = vld [vmem:[#allocation4 + $0x1d0] sm:$0xff] }
  0x47   :  { %v90_v25 = vpack.c.bf16 %v68_v15, %v68_v15  ;;  %v440_v36 = vunpack.c.l.b16 %v92_v26  ;;  %v2258_v57 = vcombine.high %v193_v52, %v201_v53  ;;  %v161_v5 = vld [vmem:[#allocation4 + $0x218] sm:$0xff] }
  0x48   :  { %1744 = vmatpush1.bf16.msra.mxu0 %v2155_v14  ;;  %1785 = vmatpush1.bf16.msra.mxu1 %v2157_v17  ;;  %v2331_v14 = vcombine.low %v270_v63, %v278_v0  ;;  %v2333_v17 = vcombine.low %v271_v2, %v279_v3  ;;  %v2257_v63 = vcombine.low %v193_v52, %v201_v53  ;;  %v160_v3 = vld [vmem:[#allocation4 + $0x210] sm:$0xff]  ;;  %v145_v13 = vld [vmem:[#allocation4 + $0x198] sm:$0xff] }
  0x49   :  { %1745 = vmatprep.subr.bf16.mxu0 %v2396_v18  ;;  %1786 = vmatprep.subr.bf16.mxu1 %v2398_v21  ;;  %v2316_v18 = vcombine.high %v254_v10, %v262_v11  ;;  %v246_v21 = vld [vmem:[#allocation4 + $0x4c0] sm:$0xff]  ;;  %v2226_v10 = vcombine.high %v161_v5, %v169_v6  ;;  %v144_v11 = vld [vmem:[#allocation4 + $0x190] sm:$0xff]  ;;  %v2225_v16 = vcombine.low %v161_v5, %v169_v6  ;;  %v137_v22 = vld [vmem:[#allocation4 + $0x158] sm:$0xff] }
  0x4a   :  { %v2299_v34 = vcombine.low %v238_v20, %v246_v21  ;;  %v2207_v23 = vcombine.low %v144_v11, %v152_v12  ;;  %v320_v52 = vld [vmem:[#allocation4 + $0x710] sm:$0xff] }
  0x4b   :  { %v328_v53 = vld [vmem:[#allocation4 + $0x750] sm:$0xff] }
  0x4c   :  { %1746 = vmatpush2.bf16.msra.mxu0 %v2395_v28  ;;  %1787 = vmatpush2.bf16.msra.mxu1 %v2397_v31  ;;  %v2300_v28 = vcombine.high %v238_v20, %v246_v21  ;;  %v230_v31 = vld [vmem:[#allocation4 + $0x440] sm:$0xff]  ;;  %v136_v20 = vld [vmem:[#allocation4 + $0x150] sm:$0xff]  ;;  %v129_v21 = vld [vmem:[#allocation4 + $0x118] sm:$0xff] }
  0x4d   :  { %1747 = vmatprep.subr.bf16.mxu0 %v2380_v32  ;;  %1788 = vmatprep.subr.bf16.mxu1 %v2382_v35  ;;  %v223_v32 = vld [vmem:[#allocation4 + $0x408] sm:$0xff]  ;;  %v438_v35 = vunpack.c.l.b16 %v90_v25  ;;  %v2284_v38 = vcombine.high %v222_v30, %v230_v31  ;;  %v2283_v44 = vcombine.low %v222_v30, %v230_v31  ;;  %v2194_v26 = vcombine.high %v129_v21, %v137_v22  ;;  %v121_v30 = vld [vmem:[#allocation4 + $0xd8] sm:$0xff]  ;;  %v288_v5 = vld [vmem:[#allocation4 + $0x610] sm:$0xff] }
  0x4e   :  { %v2286_v39 = vcombine.high %v223_v32, %v231_v33  ;;  %v296_v6 = vld [vmem:[#allocation4 + $0x650] sm:$0xff] }
  0x4f   :  { %v443_v45 = vsel %vm442_vm1, %v440_v36, %v438_v35  ;;  %v96_v35 = vld [vmem:[#allocation4 + $0x10] sm:$0xff] }
  0x50   :  { %1748 = vmatpush2.bf16.msra.mxu0 %v2379_v42  ;;  %1789 = vmatpush2.bf16.msra.mxu1 %v2381_v43  ;;  %v209_v42 = vld [vmem:[#allocation4 + $0x398] sm:$0xff]  ;;  %v2532_v51 = vpack.c.b16 %v443_v45, %v443_v45  ;;  %v104_v36 = vld [vmem:[#allocation4 + $0x50] sm:$0xff] }
  0x51   :  { %1749 = vmatprep.subr.bf16.mxu0 %v2364_v46  ;;  %1790 = vmatprep.subr.bf16.mxu1 %v2366_v49  ;;  %v217_v43 = vld [vmem:[#allocation4 + $0x3d8] sm:$0xff]  ;;  %v2285_v46 = vcombine.low %v223_v32, %v231_v33  ;;  %v192_v49 = vld [vmem:[#allocation4 + $0x310] sm:$0xff]  ;;  %v2193_v32 = vcombine.low %v129_v21, %v137_v22  ;;  %v2160_v41 = vcombine.high %v96_v35, %v104_v36 }
  0x52   :  { %v2274_v48 = vcombine.high %v209_v42, %v217_v43  ;;  %v2273_v55 = vcombine.low %v209_v42, %v217_v43  ;;  %v336_v43 = vld [vmem:[#allocation4 + $0x790] sm:$0xff]  ;;  %v337_v45 = vld [vmem:[#allocation4 + $0x798] sm:$0xff] }
  0x53   :  { %v256_v21 = vld [vmem:[#allocation4 + $0x510] sm:$0xff] }
  0x54   :  { %1750 = vmatpush2.bf16.msra.mxu0 %v2363_v56  ;;  %1791 = vmatpush2.bf16.msra.mxu1 %v2365_v59  ;;  %v2256_v56 = vcombine.high %v192_v49, %v200_v50  ;;  %v184_v59 = vld [vmem:[#allocation4 + $0x2d0] sm:$0xff] }
  0x55   :  { %1751 = vmatprep.subr.bf16.mxu0 %v2348_v60  ;;  %1792 = vmatprep.subr.bf16.mxu1 %v2350_v62  ;;  %v177_v60 = vld [vmem:[#allocation4 + $0x298] sm:$0xff]  ;;  %v2255_v62 = vcombine.low %v192_v49, %v200_v50  ;;  %v2240_v0 = vcombine.high %v176_v58, %v184_v59  ;;  %v264_v22 = vld [vmem:[#allocation4 + $0x550] sm:$0xff] }
  0x56   :  { %v2242_v2 = vcombine.high %v177_v60, %v185_v61 }
  0x58   :  { %1752 = vmatpush2.bf16.msra.mxu0 %v2347_v4  ;;  %1793 = vmatpush2.bf16.msra.mxu1 %v2349_v7  ;;  %v168_v4 = vld [vmem:[#allocation4 + $0x250] sm:$0xff]  ;;  %v2239_v7 = vcombine.low %v176_v58, %v184_v59  ;;  %v2384_v58 = vcombine.high %v320_v52, %v328_v53 }
  0x59   :  { %1753 = vmatprep.subr.bf16.mxu0 %v2332_v8  ;;  %1794 = vmatprep.subr.bf16.mxu1 %v2334_v9  ;;  %v2241_v8 = vcombine.low %v177_v60, %v185_v61  ;;  %v2224_v9 = vcombine.high %v160_v3, %v168_v4  ;;  %v2223_v15 = vcombine.low %v160_v3, %v168_v4  ;;  %v304_v60 = vld [vmem:[#allocation4 + $0x690] sm:$0xff] }
  0x5a   :  { %v312_v61 = vld [vmem:[#allocation4 + $0x6d0] sm:$0xff] }
  0x5b   :  { %v2368_v3 = vcombine.high %v304_v60, %v312_v61 }
  0x5c   :  { %1754 = vmatpush2.bf16.msra.mxu0 %v2331_v14  ;;  %1795 = vmatpush2.bf16.msra.mxu1 %v2333_v17  ;;  %v153_v14 = vld [vmem:[#allocation4 + $0x1d8] sm:$0xff]  ;;  %v2208_v17 = vcombine.high %v144_v11, %v152_v12  ;;  %v2352_v11 = vcombine.high %v288_v5, %v296_v6 }
  0x5d   :  { %1755 = vmatprep.subr.bf16.mxu0 %v2316_v18  ;;  %1796 = vmatprep.subr.bf16.mxu1 %v2318_v19  ;;  %v2210_v18 = vcombine.high %v145_v13, %v153_v14  ;;  %v128_v19 = vld [vmem:[#allocation4 + $0x110] sm:$0xff] }
  0x5e   :  { %v2192_v25 = vcombine.high %v128_v19, %v136_v20  ;;  %v2191_v31 = vcombine.low %v128_v19, %v136_v20 }
  0x60   :  { %1756 = vmatpush2.bf16.msra.mxu0 %v2315_v24  ;;  %1797 = vmatpush2.bf16.msra.mxu1 %v2317_v27  ;;  %v2209_v24 = vcombine.low %v145_v13, %v153_v14  ;;  %v112_v27 = vld [vmem:[#allocation4 + $0x90] sm:$0xff] }
  0x61   :  { %1757 = vmatprep.subr.bf16.mxu0 %v2300_v28  ;;  %1798 = vmatprep.subr.bf16.mxu1 %v2302_v29  ;;  %v120_v28 = vld [vmem:[#allocation4 + $0xd0] sm:$0xff]  ;;  %v113_v29 = vld [vmem:[#allocation4 + $0x98] sm:$0xff] }
  0x62   :  { %v2176_v33 = vcombine.high %v112_v27, %v120_v28  ;;  %v2177_v40 = vcombine.low %v113_v29, %v121_v30  ;;  %v272_v13 = vld [vmem:[#allocation4 + $0x590] sm:$0xff] }
  0x63   :  { %v280_v14 = vld [vmem:[#allocation4 + $0x5d0] sm:$0xff] }
  0x64   :  { %1758 = vmatpush2.bf16.msra.mxu0 %v2299_v34  ;;  %1799 = vmatpush2.bf16.msra.mxu1 %v2301_v37  ;;  %v2178_v34 = vcombine.high %v113_v29, %v121_v30  ;;  %v97_v37 = vld [vmem:[#allocation4 + $0x18] sm:$0xff]  ;;  %v2336_v19 = vcombine.high %v272_v13, %v280_v14  ;;  %v240_v29 = vld [vmem:[#allocation4 + $0x490] sm:$0xff] }
  0x65   :  { %1759 = vmatprep.subr.bf16.mxu0 %v2284_v38  ;;  %1800 = vmatprep.subr.bf16.mxu1 %v2286_v39  ;;  %v105_v38 = vld [vmem:[#allocation4 + $0x58] sm:$0xff]  ;;  %v2175_v39 = vcombine.low %v112_v27, %v120_v28  ;;  %v2320_v27 = vcombine.high %v256_v21, %v264_v22  ;;  %v248_v30 = vld [vmem:[#allocation4 + $0x4d0] sm:$0xff] }
  0x66   :  { %v2162_v42 = vcombine.high %v97_v37, %v105_v38 }
  0x68   :  { %1760 = vmatpush2.bf16.msra.mxu0 %v2283_v44  ;;  %1801 = vmatpush2.bf16.msra.mxu1 %v2285_v46  ;;  %v344_v44 = vld [vmem:[#allocation4 + $0x7d0] sm:$0xff]  ;;  %v345_v46 = vld [vmem:[#allocation4 + $0x7d8] sm:$0xff] }
  0x69   :  { %1811 = vmatprep.subr.bf16.mxu0 %v2272_v47  ;;  %1852 = vmatprep.subr.bf16.mxu1 %v2274_v48  ;;  %v2159_v47 = vcombine.low %v96_v35, %v104_v36  ;;  %v2161_v48 = vcombine.low %v97_v37, %v105_v38  ;;  %v2400_v49 = vcombine.high %v336_v43, %v344_v44  ;;  %v224_v37 = vld [vmem:[#allocation4 + $0x410] sm:$0xff] }
  0x6a   :  { %v2402_v50 = vcombine.high %v337_v45, %v345_v46  ;;  %v2304_v35 = vcombine.high %v240_v29, %v248_v30  ;;  %v232_v38 = vld [vmem:[#allocation4 + $0x450] sm:$0xff] }
  0x6b   :  { %1762 = vmatmul.mubr.bf16.vlgmr.msra.gmra.mxu0 %v2532_v51  ;;  %1803 = vmatmul.mubr.bf16.vlgmr.msra.gmra.mxu1 %v2532_v51 }
  0x6c   :  { %1812 = vmatpush1.bf16.msra.mxu0 %v2271_v54  ;;  %1853 = vmatpush1.bf16.msra.mxu1 %v2273_v55  ;;  %v321_v54 = vld [vmem:[#allocation4 + $0x718] sm:$0xff] }
  0x6d   :  { %1813 = vmatprep.subr.bf16.mxu0 %v2256_v56  ;;  %1854 = vmatprep.subr.bf16.mxu1 %v2258_v57  ;;  %v329_v55 = vld [vmem:[#allocation4 + $0x758] sm:$0xff]  ;;  %v2399_v56 = vcombine.low %v336_v43, %v344_v44  ;;  %v2401_v57 = vcombine.low %v337_v45, %v345_v46  ;;  %v2288_v43 = vcombine.high %v224_v37, %v232_v38  ;;  %v210_v45 = vld [vmem:[#allocation4 + $0x3a0] sm:$0xff] }
  0x6e   :  { %1843 = vmatprep.mubr.bf16.mxu0 %v2527_v1  ;;  %1884 = vmatprep.mubr.bf16.mxu1 %v2527_v1  ;;  %v2386_v59 = vcombine.high %v321_v54, %v329_v55  ;;  %v218_v46 = vld [vmem:[#allocation4 + $0x3e0] sm:$0xff] }
  0x70   :  { %1814 = vmatpush1.bf16.msra.mxu0 %v2255_v62  ;;  %1855 = vmatpush1.bf16.msra.mxu1 %v2257_v63  ;;  %v305_v62 = vld [vmem:[#allocation4 + $0x698] sm:$0xff] }
  0x71   :  { %1815 = vmatprep.subr.bf16.mxu0 %v2240_v0  ;;  %1856 = vmatprep.subr.bf16.mxu1 %v2242_v2  ;;  %v313_v63 = vld [vmem:[#allocation4 + $0x6d8] sm:$0xff]  ;;  %v2383_v0 = vcombine.low %v320_v52, %v328_v53  ;;  %v2385_v2 = vcombine.low %v321_v54, %v329_v55  ;;  %v2276_v52 = vcombine.high %v210_v45, %v218_v46  ;;  %v194_v54 = vld [vmem:[#allocation4 + $0x320] sm:$0xff] }
  0x72   :  { %v2370_v4 = vcombine.high %v305_v62, %v313_v63  ;;  %v202_v55 = vld [vmem:[#allocation4 + $0x360] sm:$0xff] }
  0x74   :  { %1816 = vmatpush1.bf16.msra.mxu0 %v2239_v7  ;;  %1857 = vmatpush1.bf16.msra.mxu1 %v2241_v8  ;;  %v289_v7 = vld [vmem:[#allocation4 + $0x618] sm:$0xff] }
  0x75   :  { %1817 = vmatprep.subr.bf16.mxu0 %v2224_v9  ;;  %1858 = vmatprep.subr.bf16.mxu1 %v2226_v10  ;;  %v297_v8 = vld [vmem:[#allocation4 + $0x658] sm:$0xff]  ;;  %v2367_v9 = vcombine.low %v304_v60, %v312_v61  ;;  %v2369_v10 = vcombine.low %v305_v62, %v313_v63  ;;  %v2260_v60 = vcombine.high %v194_v54, %v202_v55  ;;  %v178_v62 = vld [vmem:[#allocation4 + $0x2a0] sm:$0xff] }
  0x76   :  { %v2354_v12 = vcombine.high %v289_v7, %v297_v8  ;;  %v186_v63 = vld [vmem:[#allocation4 + $0x2e0] sm:$0xff] }
  0x78   :  { %1818 = vmatpush1.bf16.msra.mxu0 %v2223_v15  ;;  %1859 = vmatpush1.bf16.msra.mxu1 %v2225_v16  ;;  %v273_v15 = vld [vmem:[#allocation4 + $0x598] sm:$0xff] }
  0x79   :  { %1819 = vmatprep.subr.bf16.mxu0 %v2208_v17  ;;  %1860 = vmatprep.subr.bf16.mxu1 %v2210_v18  ;;  %v281_v16 = vld [vmem:[#allocation4 + $0x5d8] sm:$0xff]  ;;  %v2351_v17 = vcombine.low %v288_v5, %v296_v6  ;;  %v2353_v18 = vcombine.low %v289_v7, %v297_v8  ;;  %v2244_v5 = vcombine.high %v178_v62, %v186_v63  ;;  %v162_v7 = vld [vmem:[#allocation4 + $0x220] sm:$0xff] }
  0x7a   :  { %v2338_v20 = vcombine.high %v273_v15, %v281_v16  ;;  %v170_v8 = vld [vmem:[#allocation4 + $0x260] sm:$0xff] }
  0x7c   :  { %1820 = vmatpush1.bf16.msra.mxu0 %v2207_v23  ;;  %1861 = vmatpush1.bf16.msra.mxu1 %v2209_v24  ;;  %v257_v23 = vld [vmem:[#allocation4 + $0x518] sm:$0xff] }
  0x7d   :  { %1821 = vmatprep.subr.bf16.mxu0 %v2192_v25  ;;  %1862 = vmatprep.subr.bf16.mxu1 %v2194_v26  ;;  %v265_v24 = vld [vmem:[#allocation4 + $0x558] sm:$0xff]  ;;  %v2335_v25 = vcombine.low %v272_v13, %v280_v14  ;;  %v2337_v26 = vcombine.low %v273_v15, %v281_v16  ;;  %v2228_v13 = vcombine.high %v162_v7, %v170_v8  ;;  %v146_v15 = vld [vmem:[#allocation4 + $0x1a0] sm:$0xff] }
  0x7e   :  { %v2322_v28 = vcombine.high %v257_v23, %v265_v24  ;;  %v154_v16 = vld [vmem:[#allocation4 + $0x1e0] sm:$0xff] }
  0x80   :  { %1822 = vmatpush1.bf16.msra.mxu0 %v2191_v31  ;;  %1863 = vmatpush1.bf16.msra.mxu1 %v2193_v32  ;;  %v241_v31 = vld [vmem:[#allocation4 + $0x498] sm:$0xff] }
  0x81   :  { %1823 = vmatprep.subr.bf16.mxu0 %v2176_v33  ;;  %1864 = vmatprep.subr.bf16.mxu1 %v2178_v34  ;;  %v249_v32 = vld [vmem:[#allocation4 + $0x4d8] sm:$0xff]  ;;  %v2319_v33 = vcombine.low %v256_v21, %v264_v22  ;;  %v2321_v34 = vcombine.low %v257_v23, %v265_v24  ;;  %v2212_v21 = vcombine.high %v146_v15, %v154_v16  ;;  %v130_v23 = vld [vmem:[#allocation4 + $0x120] sm:$0xff] }
  0x82   :  { %v2306_v36 = vcombine.high %v241_v31, %v249_v32  ;;  %v138_v24 = vld [vmem:[#allocation4 + $0x160] sm:$0xff] }
  0x84   :  { %1824 = vmatpush1.bf16.msra.mxu0 %v2175_v39  ;;  %1865 = vmatpush1.bf16.msra.mxu1 %v2177_v40  ;;  %v225_v39 = vld [vmem:[#allocation4 + $0x418] sm:$0xff] }
  0x85   :  { %1825 = vmatprep.subr.bf16.mxu0 %v2160_v41  ;;  %1866 = vmatprep.subr.bf16.mxu1 %v2162_v42  ;;  %v233_v40 = vld [vmem:[#allocation4 + $0x458] sm:$0xff]  ;;  %v2303_v41 = vcombine.low %v240_v29, %v248_v30  ;;  %v2305_v42 = vcombine.low %v241_v31, %v249_v32  ;;  %v2196_v29 = vcombine.high %v130_v23, %v138_v24  ;;  %v114_v31 = vld [vmem:[#allocation4 + $0xa0] sm:$0xff] }
  0x86   :  { %v2290_v44 = vcombine.high %v225_v39, %v233_v40  ;;  %v122_v32 = vld [vmem:[#allocation4 + $0xe0] sm:$0xff] }
  0x88   :  { %1826 = vmatpush1.bf16.msra.mxu0 %v2159_v47  ;;  %1867 = vmatpush1.bf16.msra.mxu1 %v2161_v48  ;;  %v211_v47 = vld [vmem:[#allocation4 + $0x3a8] sm:$0xff] }
  0x89   :  { %1827 = vmatprep.subr.bf16.mxu0 %v2400_v49  ;;  %1868 = vmatprep.subr.bf16.mxu1 %v2402_v50  ;;  %v219_v48 = vld [vmem:[#allocation4 + $0x3e8] sm:$0xff]  ;;  %v2287_v49 = vcombine.low %v224_v37, %v232_v38  ;;  %v2289_v50 = vcombine.low %v225_v39, %v233_v40  ;;  %v2180_v37 = vcombine.high %v114_v31, %v122_v32  ;;  %v98_v39 = vld [vmem:[#allocation4 + $0x20] sm:$0xff] }
  0x8a   :  { %v2278_v53 = vcombine.high %v211_v47, %v219_v48  ;;  %v106_v40 = vld [vmem:[#allocation4 + $0x60] sm:$0xff] }
  0x8c   :  { %1828 = vmatpush2.bf16.msra.mxu0 %v2399_v56  ;;  %1869 = vmatpush2.bf16.msra.mxu1 %v2401_v57  ;;  %v195_v56 = vld [vmem:[#allocation4 + $0x328] sm:$0xff] }
  0x8d   :  { %1829 = vmatprep.subr.bf16.mxu0 %v2384_v58  ;;  %1870 = vmatprep.subr.bf16.mxu1 %v2386_v59  ;;  %v203_v57 = vld [vmem:[#allocation4 + $0x368] sm:$0xff]  ;;  %v2275_v58 = vcombine.low %v210_v45, %v218_v46  ;;  %v2277_v59 = vcombine.low %v211_v47, %v219_v48  ;;  %v2164_v45 = vcombine.high %v98_v39, %v106_v40  ;;  %v338_v47 = vld [vmem:[#allocation4 + $0x7a0] sm:$0xff] }
  0x8e   :  { %v2262_v61 = vcombine.high %v195_v56, %v203_v57  ;;  %v346_v48 = vld [vmem:[#allocation4 + $0x7e0] sm:$0xff] }
  0x90   :  { %1830 = vmatpush2.bf16.msra.mxu0 %v2383_v0  ;;  %1871 = vmatpush2.bf16.msra.mxu1 %v2385_v2  ;;  %v179_v0 = vld [vmem:[#allocation4 + $0x2a8] sm:$0xff] }
  0x91   :  { %1831 = vmatprep.subr.bf16.mxu0 %v2368_v3  ;;  %1872 = vmatprep.subr.bf16.mxu1 %v2370_v4  ;;  %v187_v2 = vld [vmem:[#allocation4 + $0x2e8] sm:$0xff]  ;;  %v2259_v3 = vcombine.low %v194_v54, %v202_v55  ;;  %v2261_v4 = vcombine.low %v195_v56, %v203_v57  ;;  %v2404_v54 = vcombine.high %v338_v47, %v346_v48  ;;  %v322_v56 = vld [vmem:[#allocation4 + $0x720] sm:$0xff] }
  0x92   :  { %v2246_v6 = vcombine.high %v179_v0, %v187_v2  ;;  %v330_v57 = vld [vmem:[#allocation4 + $0x760] sm:$0xff] }
  0x94   :  { %1832 = vmatpush2.bf16.msra.mxu0 %v2367_v9  ;;  %1873 = vmatpush2.bf16.msra.mxu1 %v2369_v10  ;;  %v163_v9 = vld [vmem:[#allocation4 + $0x228] sm:$0xff] }
  0x95   :  { %1833 = vmatprep.subr.bf16.mxu0 %v2352_v11  ;;  %1874 = vmatprep.subr.bf16.mxu1 %v2354_v12  ;;  %v171_v10 = vld [vmem:[#allocation4 + $0x268] sm:$0xff]  ;;  %v2243_v11 = vcombine.low %v178_v62, %v186_v63  ;;  %v2245_v12 = vcombine.low %v179_v0, %v187_v2  ;;  %v2388_v62 = vcombine.high %v322_v56, %v330_v57  ;;  %v306_v0 = vld [vmem:[#allocation4 + $0x6a0] sm:$0xff] }
  0x96   :  { %v2230_v14 = vcombine.high %v163_v9, %v171_v10  ;;  %v314_v2 = vld [vmem:[#allocation4 + $0x6e0] sm:$0xff] }
  0x98   :  { %1834 = vmatpush2.bf16.msra.mxu0 %v2351_v17  ;;  %1875 = vmatpush2.bf16.msra.mxu1 %v2353_v18  ;;  %v147_v17 = vld [vmem:[#allocation4 + $0x1a8] sm:$0xff] }
  0x99   :  { %1835 = vmatprep.subr.bf16.mxu0 %v2336_v19  ;;  %1876 = vmatprep.subr.bf16.mxu1 %v2338_v20  ;;  %v155_v18 = vld [vmem:[#allocation4 + $0x1e8] sm:$0xff]  ;;  %v2227_v19 = vcombine.low %v162_v7, %v170_v8  ;;  %v2229_v20 = vcombine.low %v163_v9, %v171_v10  ;;  %v2372_v7 = vcombine.high %v306_v0, %v314_v2  ;;  %v290_v9 = vld [vmem:[#allocation4 + $0x620] sm:$0xff] }
  0x9a   :  { %v2214_v22 = vcombine.high %v147_v17, %v155_v18  ;;  %v298_v10 = vld [vmem:[#allocation4 + $0x660] sm:$0xff] }
  0x9c   :  { %1836 = vmatpush2.bf16.msra.mxu0 %v2335_v25  ;;  %1877 = vmatpush2.bf16.msra.mxu1 %v2337_v26  ;;  %v131_v25 = vld [vmem:[#allocation4 + $0x128] sm:$0xff] }
  0x9d   :  { %1837 = vmatprep.subr.bf16.mxu0 %v2320_v27  ;;  %1878 = vmatprep.subr.bf16.mxu1 %v2322_v28  ;;  %v139_v26 = vld [vmem:[#allocation4 + $0x168] sm:$0xff]  ;;  %v2211_v27 = vcombine.low %v146_v15, %v154_v16  ;;  %v2213_v28 = vcombine.low %v147_v17, %v155_v18  ;;  %v2356_v15 = vcombine.high %v290_v9, %v298_v10  ;;  %v274_v17 = vld [vmem:[#allocation4 + $0x5a0] sm:$0xff] }
  0x9e   :  { %v2198_v30 = vcombine.high %v131_v25, %v139_v26  ;;  %v282_v18 = vld [vmem:[#allocation4 + $0x5e0] sm:$0xff] }
  0xa0   :  { %1838 = vmatpush2.bf16.msra.mxu0 %v2319_v33  ;;  %1879 = vmatpush2.bf16.msra.mxu1 %v2321_v34  ;;  %v115_v33 = vld [vmem:[#allocation4 + $0xa8] sm:$0xff] }
  0xa1   :  { %1839 = vmatprep.subr.bf16.mxu0 %v2304_v35  ;;  %1880 = vmatprep.subr.bf16.mxu1 %v2306_v36  ;;  %v123_v34 = vld [vmem:[#allocation4 + $0xe8] sm:$0xff]  ;;  %v2195_v35 = vcombine.low %v130_v23, %v138_v24  ;;  %v2197_v36 = vcombine.low %v131_v25, %v139_v26  ;;  %v2340_v23 = vcombine.high %v274_v17, %v282_v18  ;;  %v258_v25 = vld [vmem:[#allocation4 + $0x520] sm:$0xff] }
  0xa2   :  { %v2182_v38 = vcombine.high %v115_v33, %v123_v34  ;;  %v266_v26 = vld [vmem:[#allocation4 + $0x560] sm:$0xff] }
  0xa4   :  { %1840 = vmatpush2.bf16.msra.mxu0 %v2303_v41  ;;  %1881 = vmatpush2.bf16.msra.mxu1 %v2305_v42  ;;  %v99_v41 = vld [vmem:[#allocation4 + $0x28] sm:$0xff] }
  0xa5   :  { %1841 = vmatprep.subr.bf16.mxu0 %v2288_v43  ;;  %1882 = vmatprep.subr.bf16.mxu1 %v2290_v44  ;;  %v107_v42 = vld [vmem:[#allocation4 + $0x68] sm:$0xff]  ;;  %v2179_v43 = vcombine.low %v114_v31, %v122_v32  ;;  %v2181_v44 = vcombine.low %v115_v33, %v123_v34  ;;  %v2324_v31 = vcombine.high %v258_v25, %v266_v26  ;;  %v242_v33 = vld [vmem:[#allocation4 + $0x4a0] sm:$0xff] }
  0xa6   :  { %v2166_v46 = vcombine.high %v99_v41, %v107_v42  ;;  %v250_v34 = vld [vmem:[#allocation4 + $0x4e0] sm:$0xff] }
  0xa8   :  { %1842 = vmatpush2.bf16.msra.mxu0 %v2287_v49  ;;  %1883 = vmatpush2.bf16.msra.mxu1 %v2289_v50  ;;  %v339_v49 = vld [vmem:[#allocation4 + $0x7a8] sm:$0xff] }
  0xa9   :  { %1893 = vmatprep.subr.bf16.mxu0 %v2276_v52  ;;  %1934 = vmatprep.subr.bf16.mxu1 %v2278_v53  ;;  %v347_v50 = vld [vmem:[#allocation4 + $0x7e8] sm:$0xff]  ;;  %v2163_v52 = vcombine.low %v98_v39, %v106_v40  ;;  %v2165_v53 = vcombine.low %v99_v41, %v107_v42  ;;  %v2308_v39 = vcombine.high %v242_v33, %v250_v34  ;;  %v226_v41 = vld [vmem:[#allocation4 + $0x420] sm:$0xff] }
  0xaa   :  { %v2406_v55 = vcombine.high %v339_v49, %v347_v50  ;;  %v234_v42 = vld [vmem:[#allocation4 + $0x460] sm:$0xff] }
  0xab   :  { %1844 = vmatmul.mubr.bf16.vlgmr.msra.gmra.mxu0 %v2532_v51  ;;  %1885 = vmatmul.mubr.bf16.vlgmr.msra.gmra.mxu1 %v2532_v51 }
  0xac   :  { %1894 = vmatpush1.bf16.msra.mxu0 %v2275_v58  ;;  %1935 = vmatpush1.bf16.msra.mxu1 %v2277_v59  ;;  %v323_v58 = vld [vmem:[#allocation4 + $0x728] sm:$0xff] }
  0xad   :  { %1895 = vmatprep.subr.bf16.mxu0 %v2260_v60  ;;  %1936 = vmatprep.subr.bf16.mxu1 %v2262_v61  ;;  %v331_v59 = vld [vmem:[#allocation4 + $0x768] sm:$0xff]  ;;  %v2403_v60 = vcombine.low %v338_v47, %v346_v48  ;;  %v2405_v61 = vcombine.low %v339_v49, %v347_v50  ;;  %v2292_v47 = vcombine.high %v226_v41, %v234_v42  ;;  %v212_v49 = vld [vmem:[#allocation4 + $0x3b0] sm:$0xff] }
  0xae   :  { %1925 = vmatprep.mubr.bf16.mxu0 %v2527_v1  ;;  %1966 = vmatprep.mubr.bf16.mxu1 %v2527_v1  ;;  %v2390_v63 = vcombine.high %v323_v58, %v331_v59  ;;  %v220_v50 = vld [vmem:[#allocation4 + $0x3f0] sm:$0xff] }
  0xb0   :  { %1896 = vmatpush1.bf16.msra.mxu0 %v2259_v3  ;;  %1937 = vmatpush1.bf16.msra.mxu1 %v2261_v4  ;;  %v307_v3 = vld [vmem:[#allocation4 + $0x6a8] sm:$0xff] }
  0xb1   :  { %1897 = vmatprep.subr.bf16.mxu0 %v2244_v5  ;;  %1938 = vmatprep.subr.bf16.mxu1 %v2246_v6  ;;  %v315_v4 = vld [vmem:[#allocation4 + $0x6e8] sm:$0xff]  ;;  %v2387_v5 = vcombine.low %v322_v56, %v330_v57  ;;  %v2389_v6 = vcombine.low %v323_v58, %v331_v59  ;;  %v2280_v56 = vcombine.high %v212_v49, %v220_v50  ;;  %v196_v58 = vld [vmem:[#allocation4 + $0x330] sm:$0xff] }
  0xb2   :  { %v2374_v8 = vcombine.high %v307_v3, %v315_v4  ;;  %v204_v59 = vld [vmem:[#allocation4 + $0x370] sm:$0xff] }
  0xb4   :  { %1898 = vmatpush1.bf16.msra.mxu0 %v2243_v11  ;;  %1939 = vmatpush1.bf16.msra.mxu1 %v2245_v12  ;;  %v291_v11 = vld [vmem:[#allocation4 + $0x628] sm:$0xff] }
  0xb5   :  { %1899 = vmatprep.subr.bf16.mxu0 %v2228_v13  ;;  %1940 = vmatprep.subr.bf16.mxu1 %v2230_v14  ;;  %v299_v12 = vld [vmem:[#allocation4 + $0x668] sm:$0xff]  ;;  %v2371_v13 = vcombine.low %v306_v0, %v314_v2  ;;  %v2373_v14 = vcombine.low %v307_v3, %v315_v4  ;;  %v2264_v0 = vcombine.high %v196_v58, %v204_v59  ;;  %v180_v3 = vld [vmem:[#allocation4 + $0x2b0] sm:$0xff] }
  0xb6   :  { %v2358_v16 = vcombine.high %v291_v11, %v299_v12  ;;  %v188_v4 = vld [vmem:[#allocation4 + $0x2f0] sm:$0xff] }
  0xb8   :  { %1900 = vmatpush1.bf16.msra.mxu0 %v2227_v19  ;;  %1941 = vmatpush1.bf16.msra.mxu1 %v2229_v20  ;;  %v275_v19 = vld [vmem:[#allocation4 + $0x5a8] sm:$0xff] }
  0xb9   :  { %1901 = vmatprep.subr.bf16.mxu0 %v2212_v21  ;;  %1942 = vmatprep.subr.bf16.mxu1 %v2214_v22  ;;  %v283_v20 = vld [vmem:[#allocation4 + $0x5e8] sm:$0xff]  ;;  %v2355_v21 = vcombine.low %v290_v9, %v298_v10  ;;  %v2357_v22 = vcombine.low %v291_v11, %v299_v12  ;;  %v2248_v9 = vcombine.high %v180_v3, %v188_v4  ;;  %v164_v11 = vld [vmem:[#allocation4 + $0x230] sm:$0xff] }
  0xba   :  { %v2342_v24 = vcombine.high %v275_v19, %v283_v20  ;;  %v172_v12 = vld [vmem:[#allocation4 + $0x270] sm:$0xff] }
  0xbc   :  { %1902 = vmatpush1.bf16.msra.mxu0 %v2211_v27  ;;  %1943 = vmatpush1.bf16.msra.mxu1 %v2213_v28  ;;  %v259_v27 = vld [vmem:[#allocation4 + $0x528] sm:$0xff] }
  0xbd   :  { %1903 = vmatprep.subr.bf16.mxu0 %v2196_v29  ;;  %1944 = vmatprep.subr.bf16.mxu1 %v2198_v30  ;;  %v267_v28 = vld [vmem:[#allocation4 + $0x568] sm:$0xff]  ;;  %v2339_v29 = vcombine.low %v274_v17, %v282_v18  ;;  %v2341_v30 = vcombine.low %v275_v19, %v283_v20  ;;  %v2232_v17 = vcombine.high %v164_v11, %v172_v12  ;;  %v148_v19 = vld [vmem:[#allocation4 + $0x1b0] sm:$0xff] }
  0xbe   :  { %v2326_v32 = vcombine.high %v259_v27, %v267_v28  ;;  %v156_v20 = vld [vmem:[#allocation4 + $0x1f0] sm:$0xff] }
  0xc0   :  { %1904 = vmatpush1.bf16.msra.mxu0 %v2195_v35  ;;  %1945 = vmatpush1.bf16.msra.mxu1 %v2197_v36  ;;  %v243_v35 = vld [vmem:[#allocation4 + $0x4a8] sm:$0xff] }
  0xc1   :  { %1905 = vmatprep.subr.bf16.mxu0 %v2180_v37  ;;  %1946 = vmatprep.subr.bf16.mxu1 %v2182_v38  ;;  %v251_v36 = vld [vmem:[#allocation4 + $0x4e8] sm:$0xff]  ;;  %v2323_v37 = vcombine.low %v258_v25, %v266_v26  ;;  %v2325_v38 = vcombine.low %v259_v27, %v267_v28  ;;  %v2216_v25 = vcombine.high %v148_v19, %v156_v20  ;;  %v132_v26 = vld [vmem:[#allocation4 + $0x130] sm:$0xff]  ;;  %v133_v28 = vld [vmem:[#allocation4 + $0x138] sm:$0xff] }
  0xc2   :  { %v2310_v40 = vcombine.high %v243_v35, %v251_v36  ;;  %v140_v27 = vld [vmem:[#allocation4 + $0x170] sm:$0xff] }
  0xc4   :  { %1906 = vmatpush1.bf16.msra.mxu0 %v2179_v43  ;;  %1947 = vmatpush1.bf16.msra.mxu1 %v2181_v44  ;;  %v227_v43 = vld [vmem:[#allocation4 + $0x428] sm:$0xff] }
  0xc5   :  { %1907 = vmatprep.subr.bf16.mxu0 %v2164_v45  ;;  %1948 = vmatprep.subr.bf16.mxu1 %v2166_v46  ;;  %v235_v44 = vld [vmem:[#allocation4 + $0x468] sm:$0xff]  ;;  %v2307_v45 = vcombine.low %v242_v33, %v250_v34  ;;  %v2309_v46 = vcombine.low %v243_v35, %v251_v36  ;;  %v116_v34 = vld [vmem:[#allocation4 + $0xb0] sm:$0xff]  ;;  %v117_v36 = vld [vmem:[#allocation4 + $0xb8] sm:$0xff] }
  0xc6   :  { %v2294_v48 = vcombine.high %v227_v43, %v235_v44  ;;  %v124_v35 = vld [vmem:[#allocation4 + $0xf0] sm:$0xff] }
  0xc8   :  { %1908 = vmatpush1.bf16.msra.mxu0 %v2163_v52  ;;  %1949 = vmatpush1.bf16.msra.mxu1 %v2165_v53  ;;  %v213_v52 = vld [vmem:[#allocation4 + $0x3b8] sm:$0xff] }
  0xc9   :  { %1909 = vmatprep.subr.bf16.mxu0 %v2404_v54  ;;  %1950 = vmatprep.subr.bf16.mxu1 %v2406_v55  ;;  %v221_v53 = vld [vmem:[#allocation4 + $0x3f8] sm:$0xff]  ;;  %v2291_v54 = vcombine.low %v226_v41, %v234_v42  ;;  %v2293_v55 = vcombine.low %v227_v43, %v235_v44  ;;  %v100_v42 = vld [vmem:[#allocation4 + $0x30] sm:$0xff] }
  0xca   :  { %v2282_v57 = vcombine.high %v213_v52, %v221_v53  ;;  %v108_v43 = vld [vmem:[#allocation4 + $0x70] sm:$0xff]  ;;  %v101_v44 = vld [vmem:[#allocation4 + $0x38] sm:$0xff] }
  0xcc   :  { %1910 = vmatpush2.bf16.msra.mxu0 %v2403_v60  ;;  %1951 = vmatpush2.bf16.msra.mxu1 %v2405_v61  ;;  %v197_v60 = vld [vmem:[#allocation4 + $0x338] sm:$0xff] }
  0xcd   :  { %1911 = vmatprep.subr.bf16.mxu0 %v2388_v62  ;;  %1952 = vmatprep.subr.bf16.mxu1 %v2390_v63  ;;  %v205_v61 = vld [vmem:[#allocation4 + $0x378] sm:$0xff]  ;;  %v2279_v62 = vcombine.low %v212_v49, %v220_v50  ;;  %v2281_v63 = vcombine.low %v213_v52, %v221_v53  ;;  %v340_v50 = vld [vmem:[#allocation4 + $0x7b0] sm:$0xff] }
  0xce   :  { %v2266_v2 = vcombine.high %v197_v60, %v205_v61  ;;  %v348_v52 = vld [vmem:[#allocation4 + $0x7f0] sm:$0xff]  ;;  %v341_v53 = vld [vmem:[#allocation4 + $0x7b8] sm:$0xff] }
  0xd0   :  { %1912 = vmatpush2.bf16.msra.mxu0 %v2387_v5  ;;  %1953 = vmatpush2.bf16.msra.mxu1 %v2389_v6  ;;  %v181_v5 = vld [vmem:[#allocation4 + $0x2b8] sm:$0xff] }
  0xd1   :  { %1913 = vmatprep.subr.bf16.mxu0 %v2372_v7  ;;  %1954 = vmatprep.subr.bf16.mxu1 %v2374_v8  ;;  %v189_v6 = vld [vmem:[#allocation4 + $0x2f8] sm:$0xff]  ;;  %v2263_v7 = vcombine.low %v196_v58, %v204_v59  ;;  %v2265_v8 = vcombine.low %v197_v60, %v205_v61  ;;  %v324_v59 = vld [vmem:[#allocation4 + $0x730] sm:$0xff] }
  0xd2   :  { %v2250_v10 = vcombine.high %v181_v5, %v189_v6  ;;  %v332_v60 = vld [vmem:[#allocation4 + $0x770] sm:$0xff]  ;;  %v325_v61 = vld [vmem:[#allocation4 + $0x738] sm:$0xff] }
  0xd4   :  { %1914 = vmatpush2.bf16.msra.mxu0 %v2371_v13  ;;  %1955 = vmatpush2.bf16.msra.mxu1 %v2373_v14  ;;  %v165_v13 = vld [vmem:[#allocation4 + $0x238] sm:$0xff] }
  0xd5   :  { %1915 = vmatprep.subr.bf16.mxu0 %v2356_v15  ;;  %1956 = vmatprep.subr.bf16.mxu1 %v2358_v16  ;;  %v173_v14 = vld [vmem:[#allocation4 + $0x278] sm:$0xff]  ;;  %v2247_v15 = vcombine.low %v180_v3, %v188_v4  ;;  %v2249_v16 = vcombine.low %v181_v5, %v189_v6  ;;  %v308_v4 = vld [vmem:[#allocation4 + $0x6b0] sm:$0xff] }
  0xd6   :  { %v2234_v18 = vcombine.high %v165_v13, %v173_v14  ;;  %v316_v5 = vld [vmem:[#allocation4 + $0x6f0] sm:$0xff]  ;;  %v309_v6 = vld [vmem:[#allocation4 + $0x6b8] sm:$0xff] }
  0xd8   :  { %1916 = vmatpush2.bf16.msra.mxu0 %v2355_v21  ;;  %1957 = vmatpush2.bf16.msra.mxu1 %v2357_v22  ;;  %v149_v21 = vld [vmem:[#allocation4 + $0x1b8] sm:$0xff] }
  0xd9   :  { %1917 = vmatprep.subr.bf16.mxu0 %v2340_v23  ;;  %1958 = vmatprep.subr.bf16.mxu1 %v2342_v24  ;;  %v157_v22 = vld [vmem:[#allocation4 + $0x1f8] sm:$0xff]  ;;  %v2231_v23 = vcombine.low %v164_v11, %v172_v12  ;;  %v2233_v24 = vcombine.low %v165_v13, %v173_v14  ;;  %v292_v12 = vld [vmem:[#allocation4 + $0x630] sm:$0xff] }
  0xda   :  { %v300_v13 = vld [vmem:[#allocation4 + $0x670] sm:$0xff]  ;;  %v293_v14 = vld [vmem:[#allocation4 + $0x638] sm:$0xff] }
  0xdc   :  { %1918 = vmatpush2.bf16.msra.mxu0 %v2339_v29  ;;  %1959 = vmatpush2.bf16.msra.mxu1 %v2341_v30  ;;  %v141_v29 = vld [vmem:[#allocation4 + $0x178] sm:$0xff]  ;;  %v2215_v30 = vcombine.low %v148_v19, %v156_v20  ;;  %v276_v20 = vld [vmem:[#allocation4 + $0x5b0] sm:$0xff] }
  0xdd   :  { %1919 = vmatprep.subr.bf16.mxu0 %v2324_v31  ;;  %1960 = vmatprep.subr.bf16.mxu1 %v2326_v32  ;;  %v2217_v31 = vcombine.low %v149_v21, %v157_v22  ;;  %v2200_v32 = vcombine.high %v132_v26, %v140_v27  ;;  %v2202_v33 = vcombine.high %v133_v28, %v141_v29 }
  0xe0   :  { %1920 = vmatpush2.bf16.msra.mxu0 %v2323_v37  ;;  %1961 = vmatpush2.bf16.msra.mxu1 %v2325_v38  ;;  %v125_v37 = vld [vmem:[#allocation4 + $0xf8] sm:$0xff]  ;;  %v2199_v38 = vcombine.low %v132_v26, %v140_v27  ;;  %v260_v27 = vld [vmem:[#allocation4 + $0x530] sm:$0xff] }
  0xe1   :  { %1921 = vmatprep.subr.bf16.mxu0 %v2308_v39  ;;  %1962 = vmatprep.subr.bf16.mxu1 %v2310_v40  ;;  %v2201_v39 = vcombine.low %v133_v28, %v141_v29  ;;  %v2184_v40 = vcombine.high %v116_v34, %v124_v35  ;;  %v2186_v41 = vcombine.high %v117_v36, %v125_v37  ;;  %v268_v28 = vld [vmem:[#allocation4 + $0x570] sm:$0xff]  ;;  %v261_v29 = vld [vmem:[#allocation4 + $0x538] sm:$0xff] }
  0xe4   :  { %1922 = vmatpush2.bf16.msra.mxu0 %v2307_v45  ;;  %1963 = vmatpush2.bf16.msra.mxu1 %v2309_v46  ;;  %v109_v45 = vld [vmem:[#allocation4 + $0x78] sm:$0xff]  ;;  %v2183_v46 = vcombine.low %v116_v34, %v124_v35  ;;  %v244_v35 = vld [vmem:[#allocation4 + $0x4b0] sm:$0xff] }
  0xe5   :  { %1923 = vmatprep.subr.bf16.mxu0 %v2292_v47  ;;  %1964 = vmatprep.subr.bf16.mxu1 %v2294_v48  ;;  %v2185_v47 = vcombine.low %v117_v36, %v125_v37  ;;  %v2168_v48 = vcombine.high %v100_v42, %v108_v43  ;;  %v2170_v49 = vcombine.high %v101_v44, %v109_v45  ;;  %v252_v36 = vld [vmem:[#allocation4 + $0x4f0] sm:$0xff]  ;;  %v245_v37 = vld [vmem:[#allocation4 + $0x4b8] sm:$0xff] }
  0xe8   :  { %1924 = vmatpush2.bf16.msra.mxu0 %v2291_v54  ;;  %1965 = vmatpush2.bf16.msra.mxu1 %v2293_v55  ;;  %v349_v54 = vld [vmem:[#allocation4 + $0x7f8] sm:$0xff]  ;;  %v2167_v55 = vcombine.low %v100_v42, %v108_v43  ;;  %v2312_v42 = vcombine.high %v244_v35, %v252_v36 }
  0xe9   :  { %1975 = vmatprep.subr.bf16.mxu0 %v2280_v56  ;;  %2016 = vmatprep.subr.bf16.mxu1 %v2282_v57  ;;  %v2169_v56 = vcombine.low %v101_v44, %v109_v45  ;;  %v2408_v57 = vcombine.high %v340_v50, %v348_v52  ;;  %v2410_v58 = vcombine.high %v341_v53, %v349_v54  ;;  %v228_v44 = vld [vmem:[#allocation4 + $0x430] sm:$0xff] }
  0xea   :  { %v236_v45 = vld [vmem:[#allocation4 + $0x470] sm:$0xff] }
  0xeb   :  { %1926 = vmatmul.mubr.bf16.vlgmr.msra.gmra.mxu0 %v2532_v51  ;;  %1967 = vmatmul.mubr.bf16.vlgmr.msra.gmra.mxu1 %v2532_v51 }
  0xec   :  { %1976 = vmatpush1.bf16.msra.mxu0 %v2279_v62  ;;  %2017 = vmatpush1.bf16.msra.mxu1 %v2281_v63  ;;  %v333_v62 = vld [vmem:[#allocation4 + $0x778] sm:$0xff]  ;;  %v2407_v63 = vcombine.low %v340_v50, %v348_v52  ;;  %v2296_v52 = vcombine.high %v228_v44, %v236_v45 }
  0xed   :  { %1977 = vmatprep.subr.bf16.mxu0 %v2264_v0  ;;  %2018 = vmatprep.subr.bf16.mxu1 %v2266_v2  ;;  %v2409_v0 = vcombine.low %v341_v53, %v349_v54  ;;  %v2392_v2 = vcombine.high %v324_v59, %v332_v60  ;;  %v2394_v3 = vcombine.high %v325_v61, %v333_v62 }
  0xee   :  { %2007 = vmatprep.mubr.bf16.mxu0 %v2527_v1  ;;  %2048 = vmatprep.mubr.bf16.mxu1 %v2527_v1  ;;  %v2218_v1 = vcombine.high %v149_v21, %v157_v22  ;;  %v284_v21 = vld [vmem:[#allocation4 + $0x5f0] sm:$0xff]  ;;  %v277_v22 = vld [vmem:[#allocation4 + $0x5b8] sm:$0xff]  ;;  %v2295_v54 = vcombine.low %v228_v44, %v236_v45 }
  0xf0   :  { %1978 = vmatpush1.bf16.msra.mxu0 %v2263_v7  ;;  %2019 = vmatpush1.bf16.msra.mxu1 %v2265_v8  ;;  %v317_v7 = vld [vmem:[#allocation4 + $0x6f8] sm:$0xff]  ;;  %v2391_v8 = vcombine.low %v324_v59, %v332_v60  ;;  %v2492_v60 = vmov 1983009808  }
  0xf1   :  { %1979 = vmatprep.subr.bf16.mxu0 %v2248_v9  ;;  %2020 = vmatprep.subr.bf16.mxu1 %v2250_v10  ;;  %v2393_v9 = vcombine.low %v325_v61, %v333_v62  ;;  %v2376_v10 = vcombine.high %v308_v4, %v316_v5  ;;  %v2378_v11 = vcombine.high %v309_v6, %v317_v7  ;;  %v2076_v61 = vunpack.c.l.s4 %v2492_v60 }
  0xf4   :  { %1980 = vmatpush1.bf16.msra.mxu0 %v2247_v15  ;;  %2021 = vmatpush1.bf16.msra.mxu1 %v2249_v16  ;;  %v301_v15 = vld [vmem:[#allocation4 + $0x678] sm:$0xff]  ;;  %v2375_v16 = vcombine.low %v308_v4, %v316_v5 }
  0xf5   :  { %1981 = vmatprep.subr.bf16.mxu0 %v2232_v17  ;;  %2022 = vmatprep.subr.bf16.mxu1 %v2234_v18  ;;  %v2377_v17 = vcombine.low %v309_v6, %v317_v7  ;;  %v2360_v18 = vcombine.high %v292_v12, %v300_v13  ;;  %v2362_v19 = vcombine.high %v293_v14, %v301_v15 }
  0xf8   :  { %1982 = vmatpush1.bf16.msra.mxu0 %v2231_v23  ;;  %2023 = vmatpush1.bf16.msra.mxu1 %v2233_v24  ;;  %v285_v23 = vld [vmem:[#allocation4 + $0x5f8] sm:$0xff]  ;;  %v2359_v24 = vcombine.low %v292_v12, %v300_v13 }
  0xf9   :  { %1983 = vmatprep.subr.bf16.mxu0 %v2216_v25  ;;  %2024 = vmatprep.subr.bf16.mxu1 %v2218_v1  ;;  %v2361_v25 = vcombine.low %v293_v14, %v301_v15  ;;  %v2344_v1 = vcombine.high %v276_v20, %v284_v21  ;;  %v2346_v26 = vcombine.high %v277_v22, %v285_v23 }
  0xfc   :  { %1984 = vmatpush1.bf16.msra.mxu0 %v2215_v30  ;;  %2025 = vmatpush1.bf16.msra.mxu1 %v2217_v31  ;;  %v269_v30 = vld [vmem:[#allocation4 + $0x578] sm:$0xff]  ;;  %v2343_v31 = vcombine.low %v276_v20, %v284_v21 }
  0xfd   :  { %1985 = vmatprep.subr.bf16.mxu0 %v2200_v32  ;;  %2026 = vmatprep.subr.bf16.mxu1 %v2202_v33  ;;  %v2345_v32 = vcombine.low %v277_v22, %v285_v23  ;;  %v2328_v33 = vcombine.high %v260_v27, %v268_v28  ;;  %v2330_v34 = vcombine.high %v261_v29, %v269_v30 }
 0x100   :  { %1986 = vmatpush1.bf16.msra.mxu0 %v2199_v38  ;;  %2027 = vmatpush1.bf16.msra.mxu1 %v2201_v39  ;;  %v253_v38 = vld [vmem:[#allocation4 + $0x4f8] sm:$0xff]  ;;  %v2327_v39 = vcombine.low %v260_v27, %v268_v28 }
 0x101   :  { %1987 = vmatprep.subr.bf16.mxu0 %v2184_v40  ;;  %2028 = vmatprep.subr.bf16.mxu1 %v2186_v41  ;;  %v354_v40 = vlaneseq  ;;  %v2329_v41 = vcombine.low %v261_v29, %v269_v30  ;;  %v2314_v43 = vcombine.high %v245_v37, %v253_v38  ;;  %v2313_v50 = vcombine.low %v245_v37, %v253_v38 }
 0x104   :  { %1988 = vmatpush1.bf16.msra.mxu0 %v2183_v46  ;;  %2029 = vmatpush1.bf16.msra.mxu1 %v2185_v47  ;;  %v229_v46 = vld [vmem:[#allocation4 + $0x438] sm:$0xff] }
 0x105   :  { %1989 = vmatprep.subr.bf16.mxu0 %v2168_v48  ;;  %2030 = vmatprep.subr.bf16.mxu1 %v2170_v49  ;;  %v237_v47 = vld [vmem:[#allocation4 + $0x478] sm:$0xff]  ;;  %v2311_v48 = vcombine.low %v244_v35, %v252_v36  ;;  %v2546_v49 = vshrl.u32 %v354_v40, 7 }
 0x106   :  { %v2298_v53 = vcombine.high %v229_v46, %v237_v47 }
 0x107   :  { %v360_v59 = vsub.s32 1, %v2546_v49  ;;  %v368_v62 = vsub.s32 3, %v2546_v49  ;;  %v380_v23 = vsub.s32 6, %v2546_v49 }
 0x108   :  { %1990 = vmatpush1.bf16.msra.mxu0 %v2167_v55  ;;  %2031 = vmatpush1.bf16.msra.mxu1 %v2169_v56  ;;  %v356_v55 = vsub.s32 0, %v2546_v49  ;;  %v2297_v56 = vcombine.low %v229_v46, %v237_v47  ;;  %v351_v46 = vld [vmem:[#allocation6 + $0x8] sm:$0xff] }
 0x109   :  { %1991 = vmatprep.subr.bf16.mxu0 %v2408_v57  ;;  %2032 = vmatprep.subr.bf16.mxu1 %v2410_v58  ;;  %v350_v57 = vld [vmem:[#allocation6] sm:$0xff]  ;;  %v364_v58 = vsub.s32 2, %v2546_v49 }
 0x10a   :  { %v369_v5 = vrot.slane %v350_v57, %v368_v62  ;;  %v389_v47 = vrot.slane %v351_v46, %v356_v55 }
 0x10c   :  { %1992 = vmatpush2.bf16.msra.mxu0 %v2407_v63  ;;  %2033 = vmatpush2.bf16.msra.mxu1 %v2409_v0  ;;  %v357_v63 = vrot.slane %v350_v57, %v356_v55  ;;  %v365_v0 = vrot.slane %v350_v57, %v364_v58 }
 0x10d   :  { %1993 = vmatprep.subr.bf16.mxu0 %v2392_v2  ;;  %2034 = vmatprep.subr.bf16.mxu1 %v2394_v3  ;;  %v361_v2 = vrot.slane %v350_v57, %v360_v59  ;;  %v2077_v3 = vunpack.c.0.s8 %v2076_v61 }
 0x110   :  { %1994 = vmatpush2.bf16.msra.mxu0 %v2391_v8  ;;  %2035 = vmatpush2.bf16.msra.mxu1 %v2393_v9 }
 0x111   :  { %1995 = vmatprep.subr.bf16.mxu0 %v2376_v10  ;;  %2036 = vmatprep.subr.bf16.mxu1 %v2378_v11  ;;  %v2557_v11 = vsub.s32 %v2077_v3, %v2546_v49 }
 0x114   :  { %1996 = vmatpush2.bf16.msra.mxu0 %v2375_v16  ;;  %2037 = vmatpush2.bf16.msra.mxu1 %v2377_v17 }
 0x115   :  { %1997 = vmatprep.subr.bf16.mxu0 %v2360_v18  ;;  %2038 = vmatprep.subr.bf16.mxu1 %v2362_v19 }
 0x118   :  { %1998 = vmatpush2.bf16.msra.mxu0 %v2359_v24  ;;  %2039 = vmatpush2.bf16.msra.mxu1 %v2361_v25  ;;  %v376_v24 = vsub.s32 5, %v2546_v49  ;;  %v384_v25 = vsub.s32 7, %v2546_v49 }
 0x119   :  { %1999 = vmatprep.subr.bf16.mxu0 %v2344_v1  ;;  %2040 = vmatprep.subr.bf16.mxu1 %v2346_v26  ;;  %v381_v26 = vrot.slane %v350_v57, %v380_v23 }
 0x11a   :  { %v377_v27 = vrot.slane %v350_v57, %v376_v24  ;;  %v385_v29 = vrot.slane %v350_v57, %v384_v25 }
 0x11c   :  { %2000 = vmatpush2.bf16.msra.mxu0 %v2343_v31  ;;  %2041 = vmatpush2.bf16.msra.mxu1 %v2345_v32 }
 0x11d   :  { %2001 = vmatprep.subr.bf16.mxu0 %v2328_v33  ;;  %2042 = vmatprep.subr.bf16.mxu1 %v2330_v34 }
 0x120   :  { %2002 = vmatpush2.bf16.msra.mxu0 %v2327_v39  ;;  %2043 = vmatpush2.bf16.msra.mxu1 %v2329_v41 }
 0x121   :  { %2003 = vmatprep.subr.bf16.mxu0 %v2312_v42  ;;  %2044 = vmatprep.subr.bf16.mxu1 %v2314_v43 }
 0x124   :  { %2004 = vmatpush2.bf16.msra.mxu0 %v2311_v48  ;;  %2045 = vmatpush2.bf16.msra.mxu1 %v2313_v50  ;;  %v397_v48 = vrot.slane %v351_v46, %v364_v58  ;;  %v393_v50 = vrot.slane %v351_v46, %v360_v59 }
 0x125   :  { %2005 = vmatprep.subr.bf16.mxu0 %v2296_v52  ;;  %2046 = vmatprep.subr.bf16.mxu1 %v2298_v53  ;;  %v401_v53 = vrot.slane %v351_v46, %v368_v62  ;;  %v409_v62 = vrot.slane %v351_v46, %v376_v24 }
 0x128   :  { %2006 = vmatpush2.bf16.msra.mxu0 %v2295_v54  ;;  %2047 = vmatpush2.bf16.msra.mxu1 %v2297_v56 }
 0x12b   :  { %v1763_v4 = vpop.f32.mrf.mxu0  ;;  %2008 = vmatmul.mubr.bf16.vlgmr.msra.gmra.mxu0 %v2532_v51  ;;  %v1804_v7 = vpop.f32.mrf.mxu1  ;;  %2049 = vmatmul.mubr.bf16.vlgmr.msra.gmra.mxu1 %v2532_v51  ;;  %v372_v51 = vsub.s32 4, %v2546_v49 }
 0x12c   :  { %v1764_v6 = vadd.f32 %v1763_v4, %v357_v63  ;;  %v1805_v8 = vadd.f32 %v1804_v7, %v365_v0 }
 0x12d   :  { %v1765_v9 = vpop.f32.mrf.mxu0  ;;  %v1806_v12 = vpop.f32.mrf.mxu1  ;;  %v373_v1 = vrot.slane %v350_v57, %v372_v51  ;;  %v405_v59 = vrot.slane %v351_v46, %v372_v51 }
 0x12e   :  { %v1766_v10 = vadd.f32 %v1765_v9, %v361_v2  ;;  %v1807_v13 = vadd.f32 %v1806_v12, %v369_v5  ;;  %v413_v9 = vrot.slane %v351_v46, %v380_v23 }
 0x12f   :  { %v1767_v14 = vpop.f32.mrf.mxu0  ;;  %v1808_v16 = vpop.f32.mrf.mxu1 }
 0x130   :  { %v2073_v15 = vcombine.low %v1764_v6, %v1766_v10  ;;  %v2074_v17 = vcombine.low %v1805_v8, %v1807_v13  ;;  %v417_v10 = vrot.slane %v351_v46, %v384_v25 }
 0x131   :  { %v1768_v18 = vpop.f32.mrf.mxu0  ;;  %v1809_v20 = vpop.f32.mrf.mxu1 }
 0x132   :  { %v2081_v19 = vrot.slane %v2073_v15, %v2557_v11  ;;  %v2088_v21 = vrot.slane %v2074_v17, %v2557_v11 }
 0x134   :  { %v2089_v22 = vcombine.low %v2081_v19, %v2088_v21 }
 0x136   :  { %2145 = vst [vmem:[%s2588_s3] sm:$0xff] %v2089_v22 }
 0x16b   :  { %v1845_v28 = vpop.f32.mrf.mxu0  ;;  %v1886_v31 = vpop.f32.mrf.mxu1 }
 0x16c   :  { %v1846_v30 = vadd.f32 %v1845_v28, %v373_v1  ;;  %v1887_v32 = vadd.f32 %v1886_v31, %v381_v26 }
 0x16d   :  { %v1847_v33 = vpop.f32.mrf.mxu0  ;;  %v1888_v35 = vpop.f32.mrf.mxu1 }
 0x16e   :  { %v1848_v34 = vadd.f32 %v1847_v33, %v377_v27  ;;  %v1889_v36 = vadd.f32 %v1888_v35, %v385_v29 }
 0x16f   :  { %v1849_v37 = vpop.f32.mrf.mxu0  ;;  %v1890_v39 = vpop.f32.mrf.mxu1 }
 0x170   :  { %v2090_v38 = vcombine.low %v1846_v30, %v1848_v34  ;;  %v2091_v40 = vcombine.low %v1887_v32, %v1889_v36 }
 0x171   :  { %v1850_v41 = vpop.f32.mrf.mxu0  ;;  %v1891_v43 = vpop.f32.mrf.mxu1 }
 0x172   :  { %v2098_v42 = vrot.slane %v2090_v38, %v2557_v11  ;;  %v2105_v44 = vrot.slane %v2091_v40, %v2557_v11 }
 0x174   :  { %v2106_v45 = vcombine.low %v2098_v42, %v2105_v44 }
 0x176   :  { %2146 = vst [vmem:[%s2588_s3 + $0x8] sm:$0xff] %v2106_v45 }
 0x1ab   :  { %v1927_v52 = vpop.f32.mrf.mxu0  ;;  %v1968_v56 = vpop.f32.mrf.mxu1 }
 0x1ac   :  { %v1928_v54 = vadd.f32 %v1927_v52, %v389_v47  ;;  %v1969_v57 = vadd.f32 %v1968_v56, %v397_v48 }
 0x1ad   :  { %v1929_v60 = vpop.f32.mrf.mxu0  ;;  %v1970_v63 = vpop.f32.mrf.mxu1 }
 0x1ae   :  { %v1930_v61 = vadd.f32 %v1929_v60, %v393_v50  ;;  %v1971_v0 = vadd.f32 %v1970_v63, %v401_v53 }
 0x1af   :  { %v1931_v2 = vpop.f32.mrf.mxu0  ;;  %v1972_v4 = vpop.f32.mrf.mxu1 }
 0x1b0   :  { %v2107_v3 = vcombine.low %v1928_v54, %v1930_v61  ;;  %v2108_v5 = vcombine.low %v1969_v57, %v1971_v0 }
 0x1b1   :  { %v1932_v6 = vpop.f32.mrf.mxu0  ;;  %v1973_v49 = vpop.f32.mrf.mxu1 }
 0x1b2   :  { %v2115_v7 = vrot.slane %v2107_v3, %v2557_v11  ;;  %v2122_v55 = vrot.slane %v2108_v5, %v2557_v11 }
 0x1b4   :  { %v2123_v58 = vcombine.low %v2115_v7, %v2122_v55 }
 0x1b6   :  { %2147 = vst [vmem:[%s2588_s3 + $0x10] sm:$0xff] %v2123_v58 }
 0x1eb   :  { %v2009_v8 = vpop.f32.mrf.mxu0  ;;  %v2050_v12 = vpop.f32.mrf.mxu1 }
 0x1ec   :  { %v2010_v14 = vadd.f32 %v2009_v8, %v405_v59  ;;  %v2051_v17 = vadd.f32 %v2050_v12, %v413_v9 }
 0x1ed   :  { %v2011_v13 = vpop.f32.mrf.mxu0  ;;  %v2052_v16 = vpop.f32.mrf.mxu1 }
 0x1ee   :  { %v2012_v15 = vadd.f32 %v2011_v13, %v409_v62  ;;  %v2053_v18 = vadd.f32 %v2052_v16, %v417_v10 }
 0x1ef   :  { %v2013_v19 = vpop.f32.mrf.mxu0  ;;  %v2054_v21 = vpop.f32.mrf.mxu1 }
 0x1f0   :  { %v2124_v20 = vcombine.low %v2010_v14, %v2012_v15  ;;  %v2125_v22 = vcombine.low %v2051_v17, %v2053_v18 }
 0x1f1   :  { %v2014_v1 = vpop.f32.mrf.mxu0  ;;  %v2055_v27 = vpop.f32.mrf.mxu1 }
 0x1f2   :  { %v2132_v26 = vrot.slane %v2124_v20, %v2557_v11  ;;  %v2139_v51 = vrot.slane %v2125_v22, %v2557_v11 }
 0x1f4   :  { %v2140_v24 = vcombine.low %v2132_v26, %v2139_v51 }
 0x1f6   :  { %2148 = vst [vmem:[%s2588_s3 + $0x18] sm:$0xff] %v2140_v24 }
 0x1f7   :  { %2153 = vsyncpa [#allocation3], 1 }
 0x1f8   :  { %2154 = vsyncpa [#allocation5], 1 }

</bundles_post_ra>
